<compile_context>
chip_gen: v7x
topology: tpu7x:2x2x1
jax: 0.10.0
libtpu: 0.0.40
codegen_flags: <defaults>
</compile_context>

<pallas_src>
import functools

import jax
import jax.numpy as jnp
from jax.experimental import pallas as pl
from jax.experimental.pallas import tpu as pltpu


def _neureka_kernel(x_ref, wbr_ref, bbr_ref, w3_ref, b3_ref, o_ref):
    """One grid step == (one B*T tile) x (one scale `dim` of the PyTorch loop)."""
    x = x_ref[...]                                                    # (C, TILE) bf16

    # Fused enc_0 / enc_1 / enc_2 projection.  The 3F rows of `h` ARE the
    # torch.cat([raw, wiener, iclabel], dim=-1) layout -> no concat needed.
    h = jnp.dot(wbr_ref[...], x, preferred_element_type=jnp.float32)  # (3F, TILE) f32
    h = jnp.maximum(h + bbr_ref[...], 0.0)                            # bias + ReLU in f32

    # enc_3 combiner (shared across scales).
    out = jnp.dot(w3_ref[...], h.astype(w3_ref.dtype),
                  preferred_element_type=jnp.float32)                 # (O, TILE) f32
    o_ref[...] = (out + b3_ref[...]).astype(o_ref.dtype)


def _pick_tile(bt, requested):
    """Largest lane-dense tile that divides B*T (capped), else the full extent."""
    if requested is not None and requested % 128 == 0 and bt % requested == 0:
        return requested
    for cand in (1024, 512, 256, 128):
        if bt % cand == 0:
            return cand
    return bt  # full-extent block is always legal


@functools.partial(jax.jit, static_argnames=("num_scales", "tile_bt"))
def neureka_forward(x, params, num_scales, tile_bt=None):
    """x: [B, C, T] float32 (NCW).  Returns per-scale predictions [D, O, B*T]."""
    B, C, T = x.shape
    BT = B * T
    tile = _pick_tile(BT, tile_bt)

    w0, b0, w1, b1, w2, b2, w3, b3 = params
    F = w0.shape[-1]
    O = w3.shape[-1]
    F3 = 3 * F

    # --- layout plumbing (plain JAX, outside the kernel) ---
    # NCW -> (C, B*T): lane dim = B*T, dense multiple of 128.
    x_cols = jnp.transpose(x, (1, 0, 2)).reshape(C, BT).astype(jnp.bfloat16)
    # Fuse the three branch weights/biases per scale and transpose for W @ x.
    w_br = jnp.transpose(jnp.concatenate([w0, w1, w2], axis=-1), (0, 2, 1))
    w_br = w_br.astype(jnp.bfloat16)                                        # (D, 3F, C)
    b_br = jnp.transpose(jnp.concatenate([b0, b1, b2], axis=-1), (0, 2, 1))  # (D, 3F, 1) f32
    w3t = jnp.transpose(w3).astype(jnp.bfloat16)                             # (O, 3F)
    b3t = jnp.transpose(b3)                                                  # (O, 1) f32

    n_bt = BT // tile
    # Scale axis innermost: the x tile stays resident (same block index across
    # d) while only the tiny per-scale weights are re-fetched; bt axis is the
    # megacore-parallel one.
    grid = (n_bt, num_scales)

    in_specs = [
        pl.BlockSpec((C, tile), lambda bt, d: (0, bt)),       # x tile (shared over scales)
        pl.BlockSpec((None, F3, C), lambda bt, d: (d, 0, 0)),  # fused branch weight, scale d
        pl.BlockSpec((None, F3, 1), lambda bt, d: (d, 0, 0)),  # fused branch bias,   scale d
        pl.BlockSpec((O, F3), lambda bt, d: (0, 0)),           # enc_3 weight (shared)
        pl.BlockSpec((O, 1), lambda bt, d: (0, 0)),            # enc_3 bias   (shared)
    ]
    out_spec = pl.BlockSpec((None, O, tile), lambda bt, d: (d, 0, bt))

    flops = 2 * BT * num_scales * (F3 * C + O * F3)
    bytes_acc = (x_cols.size * 2 + w_br.size * 2 + b_br.size * 4
                 + w3t.size * 2 + b3t.size * 4 + num_scales * O * BT * 4)

    out = pl.pallas_call(
        _neureka_kernel,
        out_shape=jax.ShapeDtypeStruct((num_scales, O, BT), jnp.float32),
        grid=grid,
        in_specs=in_specs,
        out_specs=out_spec,
        compiler_params=pltpu.CompilerParams(
            dimension_semantics=("parallel", "arbitrary"),
            vmem_limit_bytes=32 * 1024 * 1024),
        cost_estimate=pl.CostEstimate(
            flops=flops, transcendentals=0, bytes_accessed=bytes_acc),
    )(x_cols, w_br, b_br, w3t, b3t)
    return out  # (D, O, B*T)


def make_params(key, num_scales, C, F, O):
    """Deterministic synthetic parameters (natural f32 layout) for the encoders."""
    ks = jax.random.split(key, 8)
    scale_in = 1.0 / jnp.sqrt(C)
    scale_cat = 1.0 / jnp.sqrt(3 * F)
    w0 = jax.random.normal(ks[0], (num_scales, C, F), jnp.float32) * scale_in
    b0 = jax.random.normal(ks[1], (num_scales, 1, F), jnp.float32) * 0.1
    w1 = jax.random.normal(ks[2], (num_scales, C, F), jnp.float32) * scale_in
    b1 = jax.random.normal(ks[3], (num_scales, 1, F), jnp.float32) * 0.1
    w2 = jax.random.normal(ks[4], (num_scales, C, F), jnp.float32) * scale_in
    b2 = jax.random.normal(ks[5], (num_scales, 1, F), jnp.float32) * 0.1
    w3 = jax.random.normal(ks[6], (3 * F, O), jnp.float32) * scale_cat
    b3 = jax.random.normal(ks[7], (1, O), jnp.float32) * 0.1
    return (w0, b0, w1, b1, w2, b2, w3, b3)


def reference_forward(x, params, num_scales):
    """Pure-JAX f32 reference replicating the PyTorch semantics. -> (D, B*T, O)."""
    B, C, T = x.shape
    xr = jnp.transpose(x, (0, 2, 1)).reshape(B * T, C)
    w0, b0, w1, b1, w2, b2, w3, b3 = params
    outs = []
    for d in range(num_scales):
        raw = jnp.maximum(xr @ w0[d] + b0[d], 0.0)
        wiener = jnp.maximum(xr @ w1[d] + b1[d], 0.0)
        iclabel = jnp.maximum(xr @ w2[d] + b2[d], 0.0)
        feat = jnp.concatenate([raw, wiener, iclabel], axis=-1)
        outs.append(feat @ w3 + b3)
    return jnp.stack(outs, axis=0)


if __name__ == "__main__":
    # Small, module-consistent shapes (EEG-style NCW input).
    B, C, T = 2, 8, 256        # batch, input channels, time samples  (B*T = 512)
    F = 16                     # per-encoder hidden feature width
    O = 4                      # combiner (enc_3) output width
    NUM_SCALES = 2             # number of multi-scale outputs (the `dim` loop)
    TILE_BT = 256              # lane-dense B*T tile -> grid (2 bt tiles, 2 scales)

    key = jax.random.PRNGKey(0)
    kx, kp = jax.random.split(key)
    x = jax.random.normal(kx, (B, C, T), jnp.float32)
    params = make_params(kp, NUM_SCALES, C, F, O)

    out = neureka_forward(x, params, NUM_SCALES, tile_bt=TILE_BT)   # (D, O, B*T)
    out = jax.block_until_ready(out)
    assert out.shape == (NUM_SCALES, O, B * T)

    ref = reference_forward(x, params, NUM_SCALES)                  # (D, B*T, O), f32
    out_btO = jnp.transpose(out, (0, 2, 1))                         # (D, B*T, O)
    # bf16 inputs/weights with f32 accumulation -> relaxed tolerance vs f32 ref.
    assert jnp.allclose(out_btO, ref, atol=5e-2, rtol=5e-2), "mismatch vs reference"

    # Re-pack into the pred_dict structure of the PyTorch module.
    pred_dict = {d: out_btO[d].reshape(B, T, O) for d in range(NUM_SCALES)}
    _ = jax.block_until_ready(pred_dict[0])

    print("KERNEL_OK")
</pallas_src>

<mosaic_0001>
module attributes {stable_mosaic.version = 11 : i64} {
  func.func @_neureka_kernel(%arg0: i32, %arg1: i32, %arg2: memref<8x256xbf16, #tpu.memory_space<vmem>>, %arg3: memref<1x48x8xbf16, #tpu.memory_space<vmem>>, %arg4: memref<1x48x1xf32, #tpu.memory_space<vmem>>, %arg5: memref<4x48xbf16, #tpu.memory_space<vmem>>, %arg6: memref<4x1xf32, #tpu.memory_space<vmem>>, %arg7: memref<1x4x256xf32, #tpu.memory_space<vmem>>) attributes {dimension_semantics = [#tpu.dimension_semantics<parallel>, #tpu.dimension_semantics<arbitrary>], iteration_bounds = array<i64: 2, 2>, scalar_prefetch = 0 : i64, scratch_operands = 0 : i64, tpu.core_type = #tpu.core_type<tc>, window_params = [{transform_indices = @transform_0, window_bounds = array<i64: 8, 256>}, {transform_indices = @transform_1, window_bounds = array<i64: 1, 48, 8>}, {transform_indices = @transform_2, window_bounds = array<i64: 1, 48, 1>}, {pipeline_mode = #tpu.pipeline_mode<synchronous>, transform_indices = @transform_3, window_bounds = array<i64: 4, 48>}, {pipeline_mode = #tpu.pipeline_mode<synchronous>, transform_indices = @transform_4, window_bounds = array<i64: 4, 1>}, {transform_indices = @transform_5, window_bounds = array<i64: 1, 4, 256>}]} {
    %c0 = arith.constant 0 : index
    %c0_0 = arith.constant 0 : index
    %0 = vector.load %arg2[%c0, %c0_0] : memref<8x256xbf16, #tpu.memory_space<vmem>>, vector<8x256xbf16>
    %c0_1 = arith.constant 0 : index
    %c0_2 = arith.constant 0 : index
    %c0_3 = arith.constant 0 : index
    %1 = vector.load %arg3[%c0_1, %c0_2, %c0_3] : memref<1x48x8xbf16, #tpu.memory_space<vmem>>, vector<1x48x8xbf16>
    %2 = vector.shape_cast %1 : vector<1x48x8xbf16> to vector<48x8xbf16>
    %cst = arith.constant dense<0.000000e+00> : vector<48x256xf32>
    %3 = tpu.matmul %2, %0, %cst {dimension_numbers = #tpu.dot_dimension_numbers<[1], [0], [0], [1], [0, 0, 1, 1], [], []>} : vector<48x8xbf16>, vector<8x256xbf16>, vector<48x256xf32> -> vector<48x256xf32>
    %c0_4 = arith.constant 0 : index
    %c0_5 = arith.constant 0 : index
    %c0_6 = arith.constant 0 : index
    %4 = vector.load %arg4[%c0_4, %c0_5, %c0_6] : memref<1x48x1xf32, #tpu.memory_space<vmem>>, vector<1x48x1xf32>
    %5 = vector.shape_cast %4 : vector<1x48x1xf32> to vector<48x1xf32>
    %6 = vector.broadcast %5 : vector<48x1xf32> to vector<48x256xf32>
    %7 = arith.addf %3, %6 : vector<48x256xf32>
    %cst_7 = arith.constant 0.000000e+00 : f32
    %8 = vector.broadcast %cst_7 : f32 to vector<48x256xf32>
    %9 = arith.maximumf %7, %8 : vector<48x256xf32>
    %c0_8 = arith.constant 0 : index
    %c0_9 = arith.constant 0 : index
    %10 = vector.load %arg5[%c0_8, %c0_9] : memref<4x48xbf16, #tpu.memory_space<vmem>>, vector<4x48xbf16>
    %11 = arith.truncf %9 : vector<48x256xf32> to vector<48x256xbf16>
    %cst_10 = arith.constant dense<0.000000e+00> : vector<4x256xf32>
    %12 = tpu.matmul %10, %11, %cst_10 {dimension_numbers = #tpu.dot_dimension_numbers<[1], [0], [0], [1], [0, 0, 1, 1], [], []>} : vector<4x48xbf16>, vector<48x256xbf16>, vector<4x256xf32> -> vector<4x256xf32>
    %c0_11 = arith.constant 0 : index
    %c0_12 = arith.constant 0 : index
    %13 = vector.load %arg6[%c0_11, %c0_12] : memref<4x1xf32, #tpu.memory_space<vmem>>, vector<4x1xf32>
    %14 = vector.broadcast %13 : vector<4x1xf32> to vector<4x256xf32>
    %15 = arith.addf %12, %14 : vector<4x256xf32>
    %c0_13 = arith.constant 0 : index
    %c0_14 = arith.constant 0 : index
    %c0_15 = arith.constant 0 : index
    %16 = vector.load %arg7[%c0_13, %c0_14, %c0_15] : memref<1x4x256xf32, #tpu.memory_space<vmem>>, vector<1x4x256xf32>
    %17 = vector.shape_cast %16 : vector<1x4x256xf32> to vector<4x256xf32>
    %18 = vector.shape_cast %15 : vector<4x256xf32> to vector<1x4x256xf32>
    tpu.vector_store %arg7[%c0_13, %c0_14, %c0_15], %18 {strides = array<i32>} : memref<1x4x256xf32, #tpu.memory_space<vmem>>, vector<1x4x256xf32>,
    return
  }
  func.func @transform_0(%arg0: i32, %arg1: i32) -> (i32, i32) {
    %c0_i32 = arith.constant 0 : i32
    %c0_i32_0 = arith.constant 0 : i32
    return %c0_i32, %arg0 : i32, i32
  }
  func.func @transform_1(%arg0: i32, %arg1: i32) -> (i32, i32, i32) {
    %c0_i32 = arith.constant 0 : i32
    %c0_i32_0 = arith.constant 0 : i32
    %c0_i32_1 = arith.constant 0 : i32
    return %arg1, %c0_i32, %c0_i32_0 : i32, i32, i32
  }
  func.func @transform_2(%arg0: i32, %arg1: i32) -> (i32, i32, i32) {
    %c0_i32 = arith.constant 0 : i32
    %c0_i32_0 = arith.constant 0 : i32
    %c0_i32_1 = arith.constant 0 : i32
    return %arg1, %c0_i32, %c0_i32_0 : i32, i32, i32
  }
  func.func @transform_3(%arg0: i32, %arg1: i32) -> (i32, i32) {
    %c0_i32 = arith.constant 0 : i32
    %c0_i32_0 = arith.constant 0 : i32
    %c0_i32_1 = arith.constant 0 : i32
    return %c0_i32, %c0_i32_0 : i32, i32
  }
  func.func @transform_4(%arg0: i32, %arg1: i32) -> (i32, i32) {
    %c0_i32 = arith.constant 0 : i32
    %c0_i32_0 = arith.constant 0 : i32
    %c0_i32_1 = arith.constant 0 : i32
    return %c0_i32, %c0_i32_0 : i32, i32
  }
  func.func @transform_5(%arg0: i32, %arg1: i32) -> (i32, i32, i32) {
    %c0_i32 = arith.constant 0 : i32
    %c0_i32_0 = arith.constant 0 : i32
    return %arg1, %c0_i32, %arg0 : i32, i32, i32
  }
}

</mosaic_0001>

<bundles_post_ra>
// kernel: neureka_forward.1
= control target key start
LH: loop header
LB: loop body
LE: loop exit
PB: predicated region body
PF: predicated region fallthrough
CT: control target
= control target key end

     0   :  { %10 = vsyncpa [#allocation3], 0  ;;  %s1000_s0 = inlined_call_operand.vmem [shape: bf16[8,512], index: 0, kind: input, shape index: {}]   ;;  %s1001_s1 = inlined_call_operand.vmem [shape: bf16[2,48,8], index: 1, kind: input, shape index: {}]   ;;  %s1002_s2 = inlined_call_operand.vmem [shape: f32[2,48,1], index: 2, kind: input, shape index: {}]   ;;  %s1003_s3 = inlined_call_operand.vmem [shape: bf16[4,48], index: 3, kind: input, shape index: {}]   ;;  %s1004_s4 = inlined_call_operand.vmem [shape: f32[4,1], index: 4, kind: input, shape index: {}]   ;;  %s1005_s5 = inlined_call_operand.hbm [shape: f32[2,4,512], index: 5, kind: output, shape index: {}]  }
   0x1   :  { %12 = vsyncpa [#allocation3 + $0x1], 0  ;;  %s848_s18 = smov 0   ;;  %s850_s19 = smov 0  }
   0x2   :  { %s852_s20 = smov 0   ;;  %s854_s21 = smov 0  }
   0x3   :  { %s856_s22 = smov 0   ;;  %s858_s23 = smov 0  }
   0x4   :  { %s860_s24 = smov 0   ;;  %s862_s25 = smov 0  }
   0x5 LB: > { %s613_s26 = sadd.s32 4294967295, %s814_s25   ;;  %s614_s27 = sadd.s32 4294967294, %s814_s25   ;;  %s814_s25 = sphi %s862_s25, %s18_s25   ;;  %s810_s24 = sphi %s860_s24, %s1020_s24   ;;  %s806_s23 = sphi %s858_s23, %s1019_s23   ;;  %s802_s22 = sphi %s856_s22, %s1018_s22   ;;  %s798_s21 = sphi %s854_s21, %s1017_s21   ;;  %s794_s20 = sphi %s852_s20, %s1016_s20   ;;  %s790_s19 = sphi %s850_s19, %s1015_s19   ;;  %s786_s18 = sphi %s848_s18, %s1014_s18  }
   0x6   : > { %s27_s28 = sadd.s32 1, %s806_s23  ;;  %s30_s29 = sadd.s32 1, %s810_s24 }
   0x7   : > { %p28_p0 = scmp.ge.s32.totalorder %s27_s28, 2  ;;  %p169_p1 = scmp.ne.s32.totalorder %s794_s20, %s790_s19 }
   0x8   : > { %p170_p2 = scmp.eq.s32.totalorder %s613_s26, 3  ;;  %p175_p5 = scmp.ne.s32.totalorder %s790_s19, %s786_s18 }
   0x9   : > { %s1022_s28 = smov (%p28_p0, %s27_s28), 0  ;;  %s1024_s29 = smov (!%p28_p0, %s30_s29), %s810_s24 }
   0xa   : > { %1008 = sst [smem:[#allocation5_spill]] %s1022_s28  ;;  %s154_s30 = ssub.s32 %s806_s23, %s1022_s28 }
   0xb   : > { %p897_p3 = por %p170_p2, %p169_p1  ;;  %p32_p4 = scmp.ge.s32.totalorder %s1024_s29, 2 }
   0xc   : > { %p176_p6 = scmp.eq.s32.totalorder %s614_s27, 3  ;;  %p617_p7 = scmp.ge.s32.totalorder %s814_s25, 1 }
   0xd   : > { %s1026_s29 = smov (%p32_p4, %s1024_s29), 0  ;;  %p225_p9 = scmp.lt.s32.totalorder %s814_s25, 5 }
   0xe   : > { %1010 = sst [smem:[#allocation6_spill]] %s1026_s29  ;;  %p906_p8 = por %p176_p6, %p175_p5 }
   0xf   : > { %s155_s8 = ssub.s32 %s810_s24, %s1026_s29  ;;  %s159_s9 = sadd.s32 1, %s794_s20 }
  0x10   : > { %s156_s10 = sor.u32 %s155_s8, %s154_s30  ;;  %p226_p10 = pnand %p617_p7, %p225_p9 }
  0x11   : > { %p157_p11 = scmp.eq.s32.totalorder %s156_s10, 0  ;;  %s917_s12 = sshll.u32 (!%p226_p10), %s802_s22, 1  ;;  %v816_v0 = vmov (!%p226_p10), 0   ;;  %vm354_vm0 = vcmask (!%p226_p10), 1043456   ;;  %vm344_vm1 = vcmask (!%p226_p10), 64512   ;;  %vm449_vm2 = vcmask (!%p226_p10), 392192  }
  0x12   : > { %229 = sbr.rel (%p226_p10) target bundleno = 509 (0x1fd), region = 40  ;;  %p269_p12 = scmp.lt.s32.totalorder (!%p226_p10), %s798_s21, 1  ;;  %393 = vmatprep.mubr.bf16.mxu0 (!%p226_p10), %v816_v0  ;;  %713 = vset.pattern.permute.xlu0 (!%p226_p10), %v816_v0  ;;  %v443_v13 = vld [vmem:[%s1004_s4] sm:$0xf] (!%p226_p10) }
  0x13   : > { %s915_s11 = scalar_select %p157_p11, %s794_s20, %s159_s9  }
  0x14   : > { %p264_p13 = scmp.lt.s32.totalorder (!%p226_p10), %s917_s12, 3  ;;  %714 = vset.pattern.permute.xlu1 (!%p226_p10), %v816_v0  ;;  %485 = vmatprep.mubr.bf16.mxu1 (!%p226_p10), %v816_v0  ;;  %v436_v63 = vld [vmem:[%s1003_s3] sm:$0x3] (!%p226_p10)  ;;  %s817_s29 = smov (!%p226_p10), [#allocation2]  }
  0x19   : > { %s270_s13 = scalar_select %p269_p12, %s798_s21, 1 }
  0x1a   : > { %s265_s14 = scalar_select %p264_p13, %s917_s12, 3 }
  0x1b   : > { %s639_s15 = smul.u32 24, %s270_s13 }
  0x1c   : > { %s620_s16 = sshll.u32 %s265_s14, 2  ;;  %s640_s17 = smul.u32 48, %s270_s13 }
  0x1d   : > { %s267_s22 = scalar_lea.vmem %s1000_s0, %s620_s16  ;;  %s273_s9 = scalar_lea.vmem %s1001_s1, %s639_s15 }
  0x1e   : > { %v281_v1 = vld [vmem:[%s267_s22] sm:$0xff]  ;;  %s278_s28 = scalar_lea.vmem %s1002_s2, %s640_s17  ;;  %v718_v12 = vld [vmem:[%s273_s9 + $0x8] sm:$0xff]   ;;  %v719_v14 = vld [vmem:[%s273_s9 + $0x10] sm:$0xff]   ;;  %s260_s15 = sand.u32 1, %s790_s19  }
  0x1f   : > { %v627_v2 = vcombine.high %v281_v1, %v281_v1  ;;  %v626_v3 = vcombine.low %v281_v1, %v281_v1  ;;  %v717_v5 = vld [vmem:[%s273_s9] sm:$0xff]   ;;  %v290_v7 = vld [vmem:[%s278_s28 + $0x10] sm:$0xff]  ;;  %v289_v8 = vld [vmem:[%s278_s28 + $0x8] sm:$0xff]  ;;  %s618_s16 = sshll.u32 %s260_s15, 3  ;;  %s635_s17 = sshll.u32 %s798_s21, 2 }
  0x20   : > { %v288_v6 = vld [vmem:[%s278_s28] sm:$0xff]  ;;  %306 = vperm.xlu1 %714, %v290_v7   ;;  %v291_v9 = vld [vmem:[%s278_s28 + $0x18] sm:$0xff]  ;;  %v293_v11 = vld [vmem:[%s278_s28 + $0x28] sm:$0xff]  ;;  %s512_s26 = sadd.s32 %s635_s17, %s917_s12  ;;  %s262_s22 = scalar_lea.vmem [#allocation2], %s618_s16 }
  0x21   : > { %628 = vmatprep.subr.msk.bf16.mxu0 %vm354_vm0, %v627_v2  ;;  %v356_v4 = vsel %vm354_vm0, %v626_v3, 0  ;;  %296 = vperm.xlu0 %713, %v288_v6   ;;  %v292_v10 = vld [vmem:[%s278_s28 + $0x20] sm:$0xff]  ;;  %s636_s27 = sshll.u32 %s512_s26, 6  ;;  %s516_s30 = sshll.u32 %s262_s22, 4  ;;  %s949_s30 = int_to_ptr.vmem [resolvable:$true] %s516_s30 }
  0x22   : > { %362 = vmatpush1.bf16.msra.mxu0 %v356_v4  ;;  %s947_s10 = scalar_lea.hbm %s1005_s5, %s636_s27  ;;  %s500_s21 = scalar_lea.sflag [#allocation3], %s260_s15 }
  0x23   : > { %s720_s12 = scalar_lea.vmem %s949_s30, 128  ;;  %s724_s13 = sshll.u32 %s817_s29, 4  ;;  %s725_s13 = int_to_ptr.vmem [resolvable:$false] %s724_s13 }
  0x24   : > { %311 = vperm.xlu1 %714, %v291_v9   ;;  %p721_p0 = scmp.ne.s32.totalorder %s949_s30, %s720_s12  ;;  %s726_s28 = scalar_lea.vmem %s725_s13, 256 }
  0x25   : > { %629 = vmatmul.mubr.msk.bf16.vlgmr.msra.gmra.mrb[0].mxu0 %vm344_vm1, %v717_v5  ;;  %301 = vperm.xlu0 %713, %v289_v8   ;;  %p727_p4 = scmp.lt.s32.totalorder %s949_s30, %s725_s13  ;;  %p728_p5 = scmp.lt.s32.totalorder %s726_s28, %s720_s12 }
  0x26   : > { %403 = vmatprep.mubr.bf16.mxu0 %v816_v0  ;;  %p722_p1 = pnand %p721_p0, %p897_p3 }
  0x27   : > { %p729_p6 = por %p728_p5, %p727_p4 }
  0x28   : > { %321 = vperm.xlu1 %714, %v293_v11   ;;  %p723_p2 = pneg %p722_p1 }
  0x29   : > { %316 = vperm.xlu0 %713, %v292_v10  }
  0x2a   : > { %p730_p7 = pnand %p729_p6, %p723_p2 }
  0x2d   : > { %630 = vmatmul.mubr.msk.bf16.gmra.mrb[4].mxu0 %vm344_vm1, %v718_v12  ;;  %446 = vperm.xlu0 %713, %v443_v13  }
  0x2e   : > { %413 = vmatprep.mubr.bf16.mxu0 %v816_v0 }
  0x35   : > { %631 = vmatmul.mubr.msk.bf16.gmra.mrb[8].mxu0 %vm344_vm1, %v719_v14 }
  0x9f   : > { %v307_v24 = vpop.permute.xlu1 %306 }
  0xa0   : > { %v297_v15 = vpop.permute.xlu0 %296 }
  0xa3   : > { %v312_v35 = vpop.permute.xlu1 %311 }
  0xa4   : > { %v302_v19 = vpop.permute.xlu0 %301 }
  0xa7   : > { %v322_v51 = vpop.permute.xlu1 %321 }
  0xa8   : > { %v317_v46 = vpop.permute.xlu0 %316 }
  0xac   : > { %v447_v0 = vpop.permute.xlu0 %446 }
  0xf8   : > { %v395_v16 = vpop.f32.mrb[0].mxu0 }
  0xf9   : > { %v396_v17 = vadd.f32 %v395_v16, %v297_v15  ;;  %v397_v18 = vpop.f32.mrb[1].mxu0 }
  0xfa   : > { %v398_v20 = vadd.f32 %v397_v18, %v297_v15  ;;  %v399_v21 = vpop.f32.mrb[2].mxu0 }
  0xfb   : > { %v400_v22 = vadd.f32 %v399_v21, %v302_v19  ;;  %v401_v23 = vpop.f32.mrb[3].mxu0  ;;  %v424_v26 = vmax.f32 %v396_v17, 0.0 }
  0xfc   : > { %v402_v25 = vadd.f32 %v401_v23, %v302_v19  ;;  %v425_v28 = vmax.f32 %v398_v20, 0.0 }
  0xfd   : > { %v426_v27 = vmax.f32 %v400_v22, 0.0 }
  0xfe   : > { %v427_v29 = vmax.f32 %v402_v25, 0.0 }
  0xff   : > { %v437_v30 = vpack.c.bf16 %v426_v27, %v424_v26 }
 0x100   : > { %v405_v31 = vpop.f32.mrb[4].mxu0  ;;  %v438_v32 = vpack.c.bf16 %v427_v29, %v425_v28 }
 0x101   : > { %v406_v33 = vadd.f32 %v405_v31, %v307_v24  ;;  %v407_v34 = vpop.f32.mrb[5].mxu0 }
 0x102   : > { %v408_v36 = vadd.f32 %v407_v34, %v307_v24  ;;  %v409_v37 = vpop.f32.mrb[6].mxu0  ;;  %453 = vmatprep.subr.bf16.mxu1 %v438_v32 }
 0x103   : > { %v410_v38 = vadd.f32 %v409_v37, %v312_v35  ;;  %v411_v39 = vpop.f32.mrb[7].mxu0  ;;  %454 = vmatpush1.bf16.msra.mxu1 %v437_v30  ;;  %v428_v41 = vmax.f32 %v406_v33, 0.0 }
 0x104   : > { %v412_v40 = vadd.f32 %v411_v39, %v312_v35  ;;  %v429_v43 = vmax.f32 %v408_v36, 0.0 }
 0x105   : > { %v430_v42 = vmax.f32 %v410_v38, 0.0 }
 0x106   : > { %v431_v44 = vmax.f32 %v412_v40, 0.0 }
 0x107   : > { %v439_v45 = vpack.c.bf16 %v430_v42, %v428_v41 }
 0x108   : > { %v440_v47 = vpack.c.bf16 %v431_v44, %v429_v43  ;;  %v415_v48 = vpop.f32.mrb[8].mxu0 }
 0x109   : > { %v416_v49 = vadd.f32 %v415_v48, %v317_v46  ;;  %v417_v50 = vpop.f32.mrb[9].mxu0 }
 0x10a   : > { %v418_v52 = vadd.f32 %v417_v50, %v317_v46  ;;  %v419_v53 = vpop.f32.mrb[10].mxu0  ;;  %455 = vmatprep.subr.bf16.mxu1 %v440_v47 }
 0x10b   : > { %v420_v54 = vadd.f32 %v419_v53, %v322_v51  ;;  %v421_v55 = vpop.f32.mrb[11].mxu0  ;;  %456 = vmatpush1.bf16.msra.mxu1 %v439_v45  ;;  %v432_v57 = vmax.f32 %v416_v49, 0.0 }
 0x10c   : > { %v422_v56 = vadd.f32 %v421_v55, %v322_v51  ;;  %v433_v59 = vmax.f32 %v418_v52, 0.0 }
 0x10d   : > { %v434_v58 = vmax.f32 %v420_v54, 0.0 }
 0x10e   : > { %v435_v60 = vmax.f32 %v422_v56, 0.0 }
 0x10f   : > { %v441_v61 = vpack.c.bf16 %v434_v58, %v432_v57 }
 0x110   : > { %v442_v62 = vpack.c.bf16 %v435_v60, %v433_v59 }
 0x112   : > { %457 = vmatprep.subr.bf16.mxu1 %v442_v62 }
 0x113   : > { %458 = vmatpush1.bf16.msra.mxu1 %v441_v61 }
 0x116   : > { %632 = vmatmul.mubr.msk.bf16.vlgmr.msra.gmra.mrb[0].mxu1 %vm449_vm2, %v436_v63 }
 0x1e9   : > { %v487_v1 = vpop.f32.mrb[0].mxu1 }
 0x1ea   : > { %v488_v2 = vadd.f32 %v487_v1, %v447_v0  ;;  %v489_v3 = vpop.f32.mrb[1].mxu1 }
 0x1eb   : > { %v490_v4 = vadd.f32 %v489_v3, %v447_v0  ;;  %v491_v5 = vpop.f32.mrb[2].mxu1 }
 0x1ec   : > { %v492_v6 = vpop.f32.mrb[3].mxu1 }
 0x1ed   : > { %v496_v7 = vcombine.low %v488_v2, %v490_v4 }
 0x1ef   : > { %498 = vst [vmem:[%s262_s22] sm:$0xff] %v496_v7 }
 0x1f0   : > { %733 = shalt.err (!%p730_p7)
}
 0x1f1   : > { %s734_s14 = scalar_lea.hbm %s947_s10, 128  ;;  %s738_s17 = scalar_lea.hbm %s1005_s5, 512 }
 0x1f2   : > { %p735_p9 = scmp.ne.s32.totalorder %s947_s10, %s734_s14  ;;  %p739_p12 = scmp.lt.u32.totalorder %s947_s10, %s1005_s5 }
 0x1f3   : > { %p740_p13 = scmp.lt.u32.totalorder %s738_s17, %s734_s14  ;;  %p742_p1 = scmp.lt.u32.totalorder %s734_s14, %s947_s10 }
 0x1f4   : > { %p736_p10 = pnand %p735_p9, %p897_p3 }
 0x1f5   : > { %p741_p0 = por %p740_p13, %p739_p12 }
 0x1f6   : > { %p737_p11 = pneg %p736_p10 }
 0x1f7   : > { %p743_p2 = por %p742_p1, %p741_p0 }
 0x1f9   : > { %p744_p4 = pnand %p743_p2, %p737_p11 }
 0x1fb   : > { %747 = shalt.err (!%p744_p4)
}
 0x1fc   : > { %641 = dma.vmem_to_hbm [thread:$0]  (%p897_p3), %s949_s30, 128, %s947_s10, %s500_s21  }
 0x1fd PF: > { %p647_p5 = scmp.ge.s32.totalorder %s814_s25, 2  ;;  %s528_s22 = sand.u32 1, %s786_s18  }
 0x1fe   : > { %s529_s8 = scalar_lea.sflag [#allocation3], %s528_s22 }
 0x1ff   : > { %p644_p6 = pnand %p647_p5, %p906_p8 }
 0x201   : > { %781 = dma.done.wait (!%p644_p6), %s529_s8, 128  }
 0x202   : > { %783 = vsyncadd (!%p644_p6), %s529_s8, 4294967168  ;;  %s18_s25 = sadd.s32 1, %s814_s25   ;;  %s1012_s6 = sld [smem:[#allocation5_spill]] }
 0x203   : > { %p15_p7 = scmp.ge.s32.totalorder %s18_s25, 6   ;;  %s1013_s30 = sld [smem:[#allocation6_spill]] }
 0x204   : > { %s1014_s18 = smov %s790_s19  ;;  %s1015_s19 = smov %s794_s20 }
 0x205   : > { %s1016_s20 = smov %s915_s11  ;;  %s1017_s21 = smov %s806_s23 }
 0x206   : > { %s1018_s22 = smov %s810_s24  ;;  %17 = sbr.rel (!%p15_p7) target bundleno = 5 (0x5), region = 81 }
 0x208   : > { %s1019_s23 = smov %s1012_s6 }
 0x209   : > { %s1020_s24 = smov %s1013_s30 }
 0x20d   :  { %534 = vsyncpa [#allocation3], 1 }
 0x20e   :  { %536 = vsyncpa [#allocation3 + $0x1], 1 }

</bundles_post_ra>
